<compile_context>
chip_gen: v5e
topology: v5e:2x2
jax: 0.10.0
libtpu: 0.0.40
codegen_flags: <defaults>
</compile_context>

<pallas_src>
import jax
import jax.numpy as jnp
from jax.experimental import pallas as pl
from jax.experimental.pallas import tpu as pltpu


def _dma_copy_kernel(x_hbm, o_hbm, sem):
    # One HBM->HBM DMA descriptor; no VMEM staging, no vector loads/stores.
    cp = pltpu.make_async_copy(x_hbm, o_hbm, sem)
    cp.start()
    cp.wait()


def _anchor_copy(x, donate=False):
    """Explicit copy anchor: single HBM->HBM DMA of the full tensor."""
    itemsize = jnp.dtype(x.dtype).itemsize
    nbytes = int(x.size) * itemsize
    kwargs = {}
    if donate:
        # Caller donates x: output aliases the input buffer (in-place anchor).
        kwargs["input_output_aliases"] = {0: 0}
    return pl.pallas_call(
        _dma_copy_kernel,
        out_shape=jax.ShapeDtypeStruct(x.shape, x.dtype),
        in_specs=[pl.BlockSpec(memory_space=pl.ANY)],
        out_specs=pl.BlockSpec(memory_space=pl.ANY),
        scratch_shapes=[pltpu.SemaphoreType.DMA(())],
        compiler_params=pltpu.CompilerParams(),
        cost_estimate=pl.CostEstimate(
            flops=0,
            transcendentals=0,
            bytes_accessed=2 * nbytes,
        ),
        **kwargs,
    )(x)


def view_as_heads(x142, x150, head_split=(12, 64), use_pallas=False,
                  donate=False):
    """Implements M.forward: x142.view(x150 + head_split).

    Default path is a free, metadata-only reshape (recommended).  Set
    use_pallas=True only if an explicit copy anchor is needed; that path is a
    single HBM->HBM DMA followed by the same free reshape.
    """
    x151 = tuple(x150) + tuple(head_split)          # operator.add on tuples
    B, S, H = x142.shape
    NH, HD = head_split
    assert x151 == (B, S, NH, HD) and H == NH * HD

    if not use_pallas:
        # Recommended path: row-major view is free in XLA.
        return jnp.reshape(x142, (B, S, NH, HD))

    flat = _anchor_copy(x142, donate=donate)
    # Head split is a free, metadata-only reshape outside the kernel.
    return jnp.reshape(flat, (B, S, NH, HD))


if __name__ == "__main__":
    # Small shapes consistent with the module's (1, 384, 768) -> (1, 384, 12, 64):
    # batch=1, seq=8, hidden=32 split into 4 heads of dim 8.
    B, S, H = 1, 8, 32
    NH, HD = 4, 8

    key = jax.random.PRNGKey(0)
    x142 = jax.random.normal(key, (B, S, H), dtype=jnp.float32)
    x150 = (B, S)

    # Reference semantics (plain reshape / torch .view, row-major).
    ref = jnp.reshape(x142, (B, S, NH, HD))

    # Default (recommended) path: zero-copy reshape, no kernel launch.
    out_default = view_as_heads(x142, x150, head_split=(NH, HD))
    out_default = jax.block_until_ready(out_default)
    assert out_default.shape == (B, S, NH, HD)
    assert out_default.dtype == x142.dtype
    assert bool(jnp.array_equal(out_default, ref))

    # Explicit copy-anchor path: single HBM->HBM DMA Pallas kernel.
    out_anchor = view_as_heads(x142, x150, head_split=(NH, HD),
                               use_pallas=True)
    out_anchor = jax.block_until_ready(out_anchor)
    assert out_anchor.shape == (B, S, NH, HD)
    assert out_anchor.dtype == x142.dtype
    assert bool(jnp.array_equal(out_anchor, ref))

    print("KERNEL_OK")
</pallas_src>

<mosaic_0001>
module attributes {stable_mosaic.version = 11 : i64} {
  func.func @_dma_copy_kernel(%arg0: memref<1x8x32xf32, #tpu.memory_space<any>>, %arg1: memref<1x8x32xf32, #tpu.memory_space<any>>, %arg2: memref<!tpu.dma_semaphore, #tpu.memory_space<semaphore_mem>>) attributes {dimension_semantics = [], scalar_prefetch = 0 : i64, scratch_operands = 1 : i64, tpu.core_type = #tpu.core_type<tc>} {
    tpu.enqueue_dma source(%arg0 : memref<1x8x32xf32, #tpu.memory_space<any>>) target(%arg1 : memref<1x8x32xf32, #tpu.memory_space<any>>) target_semaphore(%arg2 : memref<!tpu.dma_semaphore, #tpu.memory_space<semaphore_mem>>)
    tpu.wait_dma2 semaphore(%arg2 : memref<!tpu.dma_semaphore, #tpu.memory_space<semaphore_mem>>) src(%arg0 : memref<1x8x32xf32, #tpu.memory_space<any>>) dst(%arg1 : memref<1x8x32xf32, #tpu.memory_space<any>>)
    return
  }
}

</mosaic_0001>

<bundles_post_ra>
// kernel: tpu_custom_call.1
= control target key start
LH: loop header
LB: loop body
LE: loop exit
PB: predicated region body
PF: predicated region fallthrough
CT: control target
= control target key end

     0   :  { %s33_s12 = smov [#allocation2]   ;;  %s34_s13 = smov [#allocation3]   ;;  %s52_s0 = inlined_call_operand.hbm [shape: f32[1,8,32], index: 0, kind: input, shape index: {}]   ;;  %s53_s1 = inlined_call_operand.hbm [shape: f32[1,8,32], index: 1, kind: output, shape index: {}]  }
   0x1   :  { %s10_s8 = sshll.u32 %s52_s0, 4  ;;  %s12_s11 = sshll.u32 %s53_s1, 4  ;;  %s11_s8 = int_to_ptr.hbm [resolvable:$true] %s10_s8  ;;  %s13_s11 = int_to_ptr.hbm [resolvable:$true] %s12_s11 }
   0x2   :  { %s35_s14 = smov 0  }
   0x3   :  { %16 = dma.general %s11_s8, 128, %s13_s11, %s33_s12, %s34_s13, [#allocation4], %s35_s14, 0  }
   0x4   :  { %31 = dma.done.wait [#allocation2], 128 }
   0x5   :  { %32 = vsyncadd [#allocation2], 4294967168 }
   0x6   :  { %21 = vsyncmov [#allocation2] }
   0x9   :  { %s22_s15 = vpop.sfrf %21 }
   0xa   :  { %p27_p0 = scmp.ne.s32.totalorder %s22_s15, 0 }
   0xc   :  { %26 = shalt.err (%p27_p0)  }

</bundles_post_ra>
